<compile_context>
chip_gen: v6e
topology: v6e:2x2x1
jax: 0.10.0
libtpu: 0.0.40
codegen_flags: <defaults>
</compile_context>

<pallas_src>
import jax
import jax.numpy as jnp
from jax.experimental import pallas as pl
from jax.experimental.pallas import tpu as pltpu

_TARGET_BLOCK_BYTES = 2 << 20   # ~2 MiB per block: safe on v5e/v6e/v7x with double buffering
_MULTICORE_BYTES = 1 << 20      # above this, force >= 2 grid steps (v7x has 2 TensorCores)
_SUBLANE = {1: 32, 2: 16, 4: 8, 8: 8}   # sublane packing per dtype itemsize


def _copy_kernel(x_ref, o_ref):
    # Identity data path template; concrete subclass heads replace this body.
    o_ref[...] = x_ref[...]


def _pick_lane(n):
    """Largest lane width in {512, 256, 128} that divides n (0 => pad fallback)."""
    for lane in (512, 256, 128):
        if n % lane == 0:
            return lane
    return 0


def _choose_block_rows(rows, lane, itemsize):
    """Byte-budget block sizing, rounded to the dtype's sublane packing."""
    sub = _SUBLANE.get(itemsize, 8)
    budget_rows = max(sub, (_TARGET_BLOCK_BYTES // (lane * itemsize)) // sub * sub)
    total_bytes = rows * lane * itemsize
    if total_bytes > _MULTICORE_BYTES:
        # Guarantee >= 2 grid steps so v7x megacore can split the copy across
        # both TensorCores (harmless on single-core v5e/v6e).
        half_rows = (((rows + 1) // 2) + sub - 1) // sub * sub
        budget_rows = min(budget_rows, max(sub, half_rows))
    return budget_rows


def lane_dense_copy(x):
    """Lane-dense Pallas copy — scaffolding for concrete subclass heads."""
    orig_shape = x.shape
    n = x.size
    if n == 0:
        return x
    itemsize = x.dtype.itemsize

    flat = x.reshape(-1)
    lane = _pick_lane(n)
    padded_n = n
    if lane == 0:
        # Rare fallback: size not a multiple of 128 lanes -> minimal pad + slice.
        lane = 128
        padded_n = ((n + lane - 1) // lane) * lane
        flat = jnp.pad(flat, (0, padded_n - n))
    rows = padded_n // lane
    flat2d = flat.reshape(rows, lane)

    total_bytes = padded_n * itemsize
    if total_bytes <= _MULTICORE_BYTES and total_bytes <= _TARGET_BLOCK_BYTES:
        block_rows = rows                      # single fat block == full array dims
    else:
        block_rows = _choose_block_rows(rows, lane, itemsize)

    grid = (pl.cdiv(rows, block_rows),)        # ragged last block is bounds-masked

    out = pl.pallas_call(
        _copy_kernel,
        out_shape=jax.ShapeDtypeStruct((rows, lane), flat2d.dtype),
        grid=grid,
        in_specs=[pl.BlockSpec((block_rows, lane), lambda i: (i, 0))],
        out_specs=pl.BlockSpec((block_rows, lane), lambda i: (i, 0)),
        input_output_aliases={0: 0},           # reuse the input buffer in place
        compiler_params=pltpu.CompilerParams(
            dimension_semantics=("parallel",),
        ),
        cost_estimate=pl.CostEstimate(
            flops=0, transcendentals=0,
            bytes_accessed=2 * n * itemsize),  # honest: real data, not padded slab
    )(flat2d)

    out_flat = out.reshape(-1)
    if padded_n != n:
        out_flat = out_flat[:n]
    return out_flat.reshape(orig_shape)


class RolloutAuxiliaryTask:
    """Rollout-based self-supervised auxiliary task base class (Pallas port)."""

    def __init__(self, ppo_config=None, auxiliary_config=None, device=None, **kwargs):
        self.ppo_config = ppo_config
        self.auxiliary_config = auxiliary_config
        self.device = device
        # NOTE: the PyTorch __init__ creates no parameters, so nothing to init.

    def forward(self, x, materialize=False):
        # TODO(synk): PyTorch forward() raises NotImplementedError (abstract base);
        # the base class adds no computation.  Per the performance review the
        # pallas_call is elided for this semantic no-op (zero HBM traffic); the
        # optimized lane-dense copy kernel remains available as the template for
        # concrete subclass heads via materialize=True.
        if materialize:
            return lane_dense_copy(x)
        return x

    def __call__(self, *args, **kwargs):
        return self.forward(*args, **kwargs)

    def get_loss(self, map_feature, **kwargs):
        # TODO(synk): abstract method in the reference module (no loss defined).
        raise NotImplementedError


if __name__ == "__main__":
    key = jax.random.PRNGKey(0)
    # Small NCHW rollout map-feature tensor: batch=2, channels=4, spatial=16.
    x = jax.random.normal(key, (2, 4, 16, 16), dtype=jnp.float32)

    task = RolloutAuxiliaryTask(ppo_config=None, auxiliary_config=None, device=None)

    # Base-class forward: pallas_call elided (zero-cost pass-through).
    y = jax.block_until_ready(task(x))
    assert y.shape == x.shape and y.dtype == x.dtype
    assert bool(jnp.allclose(y, x))

    # Exercise the lane-dense Pallas copy kernel template once on TPU.
    z = jax.block_until_ready(task(x, materialize=True))
    assert z.shape == x.shape and z.dtype == x.dtype
    assert bool(jnp.allclose(z, x))

    print("KERNEL_OK")
</pallas_src>

<mosaic_0001>
module attributes {stable_mosaic.version = 11 : i64} {
  func.func @_copy_kernel(%arg0: i32, %arg1: memref<4x512xf32, #tpu.memory_space<vmem>>, %arg2: memref<4x512xf32, #tpu.memory_space<vmem>>) attributes {dimension_semantics = [#tpu.dimension_semantics<parallel>], iteration_bounds = array<i64: 1>, scalar_prefetch = 0 : i64, scratch_operands = 0 : i64, tpu.core_type = #tpu.core_type<tc>, window_params = [{transform_indices = @transform_0, window_bounds = array<i64: 4, 512>}, {transform_indices = @transform_1, window_bounds = array<i64: 4, 512>}]} {
    %c0 = arith.constant 0 : index
    %c0_0 = arith.constant 0 : index
    %0 = vector.load %arg1[%c0, %c0_0] : memref<4x512xf32, #tpu.memory_space<vmem>>, vector<4x512xf32>
    %c0_1 = arith.constant 0 : index
    %c0_2 = arith.constant 0 : index
    %1 = vector.load %arg2[%c0_1, %c0_2] : memref<4x512xf32, #tpu.memory_space<vmem>>, vector<4x512xf32>
    tpu.vector_store %arg2[%c0_1, %c0_2], %0 {strides = array<i32>} : memref<4x512xf32, #tpu.memory_space<vmem>>, vector<4x512xf32>,
    return
  }
  func.func @transform_0(%arg0: i32) -> (i32, i32) {
    %c0_i32 = arith.constant 0 : i32
    %c0_i32_0 = arith.constant 0 : i32
    return %arg0, %c0_i32 : i32, i32
  }
  func.func @transform_1(%arg0: i32) -> (i32, i32) {
    %c0_i32 = arith.constant 0 : i32
    %c0_i32_0 = arith.constant 0 : i32
    return %arg0, %c0_i32 : i32, i32
  }
}

</mosaic_0001>

<bundles_post_ra>
// kernel: tpu_custom_call.1
= control target key start
LH: loop header
LB: loop body
LE: loop exit
PB: predicated region body
PF: predicated region fallthrough
CT: control target
= control target key end

     0   :  { %6 = vsyncpa [#allocation3], 0  ;;  %s104_s0 = inlined_call_operand.hbm [shape: f32[4,512], index: 0, kind: input, shape index: {}, may-alias: {0,1}]   ;;  %s105_s1 = inlined_call_operand.hbm [shape: f32[4,512], index: 1, kind: output, shape index: {}, may-alias: {0,1}]  }
   0x1   :  { %7 = vsyncpa [#allocation4], 0  ;;  %s86_s6 = smov [#allocation2]  }
   0x2   :  { %s14_s7 = sshll.u32 %s86_s6, 4  ;;  %s15_s7 = int_to_ptr.vmem [resolvable:$true] %s14_s7 }
   0x3   :  { %s50_s8 = scalar_lea.vmem %s15_s7, 256  ;;  %p55_p1 = scmp.lt.s32.totalorder %s15_s7, %s15_s7 }
   0x4   :  { %p51_p0 = scmp.ne.s32.totalorder %s15_s7, %s50_s8  ;;  %p56_p2 = scmp.lt.s32.totalorder %s50_s8, %s50_s8 }
   0x6   :  { %p57_p3 = por %p56_p2, %p55_p1 }
   0x8   :  { %p58_p4 = pnand %p57_p3, %p51_p0 }
   0xa   :  { %61 = shalt.err (!%p58_p4)
}
   0xb   :  { %17 = dma.hbm_to_vmem [thread:$0]  %s104_s0, 256, %s15_s7, [#allocation3]  }
   0xc   :  { %82 = dma.done.wait [#allocation3], 256  }
   0xd   :  { %83 = vsyncadd [#allocation3], 4294967040  ;;  %s87_s11 = smov [#allocation5]   ;;  %v21_v0 = vld [vmem:[#allocation2] sm:$0xff]  ;;  %v22_v1 = vld [vmem:[#allocation2 + $0x8] sm:$0xff] }
   0xe   :  { %s31_s12 = sshll.u32 %s87_s11, 4  ;;  %23 = vst [vmem:[#allocation5] sm:$0xff] %v21_v0  ;;  %24 = vst [vmem:[#allocation5 + $0x8] sm:$0xff] %v22_v1  ;;  %s32_s12 = int_to_ptr.vmem [resolvable:$true] %s31_s12 }
   0xf   :  { %s62_s13 = scalar_lea.vmem %s32_s12, 256  ;;  %p67_p6 = scmp.lt.s32.totalorder %s32_s12, %s32_s12 }
  0x10   :  { %p63_p5 = scmp.ne.s32.totalorder %s32_s12, %s62_s13  ;;  %p68_p7 = scmp.lt.s32.totalorder %s62_s13, %s62_s13 }
  0x12   :  { %p69_p8 = por %p68_p7, %p67_p6 }
  0x14   :  { %p70_p9 = pnand %p69_p8, %p63_p5 }
  0x16   :  { %73 = shalt.err (!%p70_p9)
}
  0x17   :  { %34 = dma.vmem_to_hbm [thread:$0]  %s32_s12, 256, %s105_s1, [#allocation4]  }
  0x18   :  { %84 = dma.done.wait [#allocation4], 256  }
  0x19   :  { %85 = vsyncadd [#allocation4], 4294967040 }
  0x1a   :  { %38 = vsyncpa [#allocation3], 1 }
  0x1b   :  { %39 = vsyncpa [#allocation4], 1 }

</bundles_post_ra>
